<compile_context>
chip_gen: v6e
topology: v6e:2x2x1
jax: 0.10.0
libtpu: 0.0.40
codegen_flags: <defaults>
</compile_context>

<pallas_src>
import functools

import jax
import jax.numpy as jnp
from jax import lax
from jax.experimental import pallas as pl
from jax.experimental.pallas import tpu as pltpu


def _is_v7x():
    """Best-effort detection of a 2-TensorCore-per-chip part (v7x)."""
    try:
        kind = jax.devices()[0].device_kind.lower()
    except Exception:
        return False
    return ("v7" in kind) or ("7x" in kind)


def _const_spec(shape, single_buffer):
    """BlockSpec for a grid-invariant (weight) input."""
    index_map = lambda i, _n=len(shape): (0,) * _n
    if single_buffer and hasattr(pl, "Buffered"):
        try:
            return pl.BlockSpec(shape, index_map, pipeline_mode=pl.Buffered(1))
        except TypeError:
            pass  # older jax: fall back to the default (double-buffered) spec
    return pl.BlockSpec(shape, index_map)


def _attention_kernel(x_ref, wqkv_ref, bq_ref, bv_ref, wo_ref, o_ref,
                      *, heads, eps, mxu_dtype):
    # One grid step == `bb` batch elements (bb = 1 on v7x, bb = B on v5e/v6e).
    bb, N, D = x_ref.shape
    G = bb * heads

    x = x_ref[...]                                     # (bb, N, D) f32

    # ---- LayerNorm statistics in f32 (affine folded into the weights) ----
    mean = jnp.mean(x, axis=-1, keepdims=True)
    var = jnp.mean(jnp.square(x - mean), axis=-1, keepdims=True)
    xn = (x - mean) * lax.rsqrt(var + eps)             # (bb, N, D)

    # Replicate the normalized activations per head so that every matmul below is
    # a canonical single-leading-batch (G, M, K) @ (G, K, N) MXU call: no lane
    # slicing, no transposes, no per-head Python loop.
    xg = jnp.broadcast_to(xn[:, None], (bb, heads, N, D)).reshape(G, N, D)
    xg = xg.astype(mxu_dtype)

    wq = wqkv_ref[0]                                   # (G, D, dh)  (scale+gamma folded)
    wk = wqkv_ref[1]                                   # (G, D, dh)  (gamma folded)
    wv = wqkv_ref[2]                                   # (G, D, dh)  (gamma folded)

    # ---- Batched Q/K/V projections (beta fold -> biases; key bias dropped:
    #      it only shifts each score row by a constant, removed by softmax) ----
    q = jnp.einsum('gnd,gde->gne', xg, wq,
                   preferred_element_type=jnp.float32) + bq_ref[...]
    k = jnp.einsum('gnd,gde->gne', xg, wk,
                   preferred_element_type=jnp.float32)
    v = jnp.einsum('gnd,gde->gne', xg, wv,
                   preferred_element_type=jnp.float32) + bv_ref[...]

    # ---- Scores + numerically stable softmax (statistics in f32) ----
    s = jnp.einsum('gne,gme->gnm', q.astype(mxu_dtype), k.astype(mxu_dtype),
                   preferred_element_type=jnp.float32)            # (G, N, N)
    s = s - jnp.max(s, axis=-1, keepdims=True)
    p = jnp.exp(s)
    denom = jnp.sum(p, axis=-1, keepdims=True)
    r = pl.reciprocal(denom, approx=True)              # EUP slot (nearly free)
    r = r * (2.0 - denom * r)                          # one Newton step -> f32-exact
    p = p * r

    # ---- Attention-weighted values + output projection, batched over heads ----
    pv = jnp.einsum('gnm,gme->gne', p.astype(mxu_dtype), v.astype(mxu_dtype),
                    preferred_element_type=jnp.float32)           # (G, N, dh)
    outg = jnp.einsum('gne,ged->gnd', pv.astype(mxu_dtype), wo_ref[...],
                      preferred_element_type=jnp.float32)         # (G, N, D)

    # Reduce the per-head contributions (cheap VPU adds over the outer axis).
    o_ref[...] = jnp.sum(outg.reshape(bb, heads, N, D), axis=1)


def attention_forward(x, gamma, beta, w_qkv, w_out, *, heads, dim_head,
                      eps=1e-5, mxu_dtype=jnp.float32):
    """Attention forward.

    x:      (B, N, D) float32
    gamma:  (D,)  LayerNorm weight
    beta:   (D,)  LayerNorm bias
    w_qkv:  (D, 3*heads*dim_head)   (== PyTorch to_qkv.weight.T)
    w_out:  (heads*dim_head, D)     (== PyTorch to_out.weight.T)
    mxu_dtype: dtype fed to the MXU (use jnp.bfloat16 on v6e/v7x at real sizes;
               LN/softmax statistics always stay f32).
    """
    B, N, D = x.shape
    inner = heads * dim_head
    assert w_qkv.shape == (D, 3 * inner)
    assert w_out.shape == (inner, D)

    v7x = _is_v7x()
    # v7x: keep the batch axis on the grid so both TensorCores get work.
    # v5e/v6e (single TC): collapse the batch into one grid step.
    bb = 1 if v7x else B
    G = bb * heads
    scale = dim_head ** (-0.5)

    # ---- Wrapper-side constant folds (all free at runtime) ----
    # LayerNorm affine folded into the QKV projection; softmax scale folded into Q.
    w_folded = (gamma[:, None] * w_qkv).astype(jnp.float32)      # (D, 3*inner)
    b_folded = (beta @ w_qkv).astype(jnp.float32)                # (3*inner,)

    w_q = w_folded[:, 0 * inner:1 * inner] * scale
    w_k = w_folded[:, 1 * inner:2 * inner]
    w_v = w_folded[:, 2 * inner:3 * inner]
    b_q = b_folded[0 * inner:1 * inner] * scale
    # b_k intentionally dropped (softmax-invariant, see kernel comment).
    b_v = b_folded[2 * inner:3 * inner]

    # Head-split the weights and tile them over the bb batch elements handled per
    # grid step (g = b*heads + h), so the kernel only ever issues canonical
    # single-leading-batch matmuls.
    def head_split_w(w):   # (D, inner) -> (G, D, dh)
        w = w.reshape(D, heads, dim_head).transpose(1, 0, 2)      # (H, D, dh)
        return jnp.tile(w, (bb, 1, 1))

    def head_split_b(b):   # (inner,) -> (G, 1, dh)
        return jnp.tile(b.reshape(heads, 1, dim_head), (bb, 1, 1))

    w_qkv_g = jnp.stack([head_split_w(w_q),
                         head_split_w(w_k),
                         head_split_w(w_v)]).astype(mxu_dtype)    # (3, G, D, dh)
    b_q_g = head_split_b(b_q).astype(jnp.float32)                 # (G, 1, dh)
    b_v_g = head_split_b(b_v).astype(jnp.float32)                 # (G, 1, dh)
    w_o_g = jnp.tile(w_out.reshape(heads, dim_head, D),
                     (bb, 1, 1)).astype(mxu_dtype)                # (G, dh, D)

    kernel = functools.partial(_attention_kernel, heads=heads, eps=eps,
                               mxu_dtype=mxu_dtype)

    return pl.pallas_call(
        kernel,
        out_shape=jax.ShapeDtypeStruct((B, N, D), jnp.float32),
        grid_spec=pltpu.PrefetchScalarGridSpec(
            num_scalar_prefetch=0,
            grid=(B // bb,),
            in_specs=[
                pl.BlockSpec((bb, N, D), lambda i: (i, 0, 0)),              # x
                _const_spec((3, G, D, dim_head), v7x),                      # W_qkv (head-split)
                _const_spec((G, 1, dim_head), v7x),                         # q bias
                _const_spec((G, 1, dim_head), v7x),                         # v bias
                _const_spec((G, dim_head, D), v7x),                         # W_out (head-split)
            ],
            out_specs=pl.BlockSpec((bb, N, D), lambda i: (i, 0, 0)),
        ),
        compiler_params=pltpu.CompilerParams(
            dimension_semantics=("parallel",),
        ),
    )(x.astype(jnp.float32), w_qkv_g, b_q_g, b_v_g, w_o_g)


def _reference(x, gamma, beta, w_qkv, w_out, *, heads, dim_head, eps=1e-5):
    # Pure-JAX reference of the PyTorch forward pass (unfolded parameters).
    B, N, D = x.shape
    inner = heads * dim_head
    mean = jnp.mean(x, axis=-1, keepdims=True)
    var = jnp.mean((x - mean) ** 2, axis=-1, keepdims=True)
    xn = (x - mean) / jnp.sqrt(var + eps) * gamma + beta
    qkv = xn @ w_qkv
    q, k, v = jnp.split(qkv, 3, axis=-1)

    def to_heads(t):
        return t.reshape(B, N, heads, dim_head).transpose(0, 2, 1, 3)  # (B,H,N,dh)

    q, k, v = map(to_heads, (q, k, v))
    dots = jnp.einsum("bhnd,bhmd->bhnm", q, k) * dim_head ** (-0.5)
    attn = jax.nn.softmax(dots, axis=-1)
    out = jnp.einsum("bhnm,bhmd->bhnd", attn, v)
    out = out.transpose(0, 2, 1, 3).reshape(B, N, inner)
    return out @ w_out


if __name__ == "__main__":
    # Small, module-consistent shapes: dim=32, heads=4, dim_head=8, batch=2, seq=8.
    B, N, D = 2, 8, 32
    heads, dim_head = 4, 8
    inner = heads * dim_head

    key = jax.random.PRNGKey(0)
    kx, kq, ko = jax.random.split(key, 3)

    x = jax.random.normal(kx, (B, N, D), dtype=jnp.float32)
    # LayerNorm params perturbed deterministically so the affine path is exercised.
    gamma = jnp.ones((D,), jnp.float32) + 0.01 * jnp.arange(D, dtype=jnp.float32)
    beta = 0.02 * jnp.arange(D, dtype=jnp.float32)
    w_qkv = 0.05 * jax.random.normal(kq, (D, 3 * inner), dtype=jnp.float32)
    w_out = 0.05 * jax.random.normal(ko, (inner, D), dtype=jnp.float32)

    y = attention_forward(x, gamma, beta, w_qkv, w_out,
                          heads=heads, dim_head=dim_head)
    y = jax.block_until_ready(y)

    y_ref = _reference(x, gamma, beta, w_qkv, w_out,
                       heads=heads, dim_head=dim_head)
    assert y.shape == (B, N, D)
    # f32 MXU operands + Newton-refined softmax reciprocal -> tight agreement.
    assert jnp.allclose(y, y_ref, atol=1e-3, rtol=1e-3), "mismatch vs JAX reference"

    print("KERNEL_OK")
</pallas_src>

<mosaic_0001>
module attributes {stable_mosaic.version = 11 : i64} {
  func.func @_attention_kernel(%arg0: i32, %arg1: memref<2x8x32xf32, #tpu.memory_space<vmem>>, %arg2: memref<3x8x32x8xf32, #tpu.memory_space<vmem>>, %arg3: memref<8x1x8xf32, #tpu.memory_space<vmem>>, %arg4: memref<8x1x8xf32, #tpu.memory_space<vmem>>, %arg5: memref<8x8x32xf32, #tpu.memory_space<vmem>>, %arg6: memref<2x8x32xf32, #tpu.memory_space<vmem>>) attributes {dimension_semantics = [#tpu.dimension_semantics<parallel>], iteration_bounds = array<i64: 1>, scalar_prefetch = 0 : i64, scratch_operands = 0 : i64, tpu.core_type = #tpu.core_type<tc>, window_params = [{transform_indices = @transform_0, window_bounds = array<i64: 2, 8, 32>}, {pipeline_mode = #tpu.pipeline_mode<synchronous>, transform_indices = @transform_1, window_bounds = array<i64: 3, 8, 32, 8>}, {pipeline_mode = #tpu.pipeline_mode<synchronous>, transform_indices = @transform_2, window_bounds = array<i64: 8, 1, 8>}, {pipeline_mode = #tpu.pipeline_mode<synchronous>, transform_indices = @transform_3, window_bounds = array<i64: 8, 1, 8>}, {pipeline_mode = #tpu.pipeline_mode<synchronous>, transform_indices = @transform_4, window_bounds = array<i64: 8, 8, 32>}, {transform_indices = @transform_5, window_bounds = array<i64: 2, 8, 32>}]} {
    %c0 = arith.constant 0 : index
    %c0_0 = arith.constant 0 : index
    %c0_1 = arith.constant 0 : index
    %0 = vector.load %arg1[%c0, %c0_0, %c0_1] : memref<2x8x32xf32, #tpu.memory_space<vmem>>, vector<2x8x32xf32>
    %cst = arith.constant dense<0.000000e+00> : vector<2x8xf32>
    %1 = vector.multi_reduction <add>, %0, %cst [2] : vector<2x8x32xf32> to vector<2x8xf32>
    %2 = vector.shape_cast %1 : vector<2x8xf32> to vector<2x8x1xf32>
    %cst_2 = arith.constant 3.200000e+01 : f32
    %3 = vector.broadcast %cst_2 : f32 to vector<2x8x1xf32>
    %4 = arith.divf %2, %3 : vector<2x8x1xf32>
    %5 = vector.broadcast %4 : vector<2x8x1xf32> to vector<2x8x32xf32>
    %6 = arith.subf %0, %5 : vector<2x8x32xf32>
    %7 = arith.mulf %6, %6 : vector<2x8x32xf32>
    %cst_3 = arith.constant dense<0.000000e+00> : vector<2x8xf32>
    %8 = vector.multi_reduction <add>, %7, %cst_3 [2] : vector<2x8x32xf32> to vector<2x8xf32>
    %9 = vector.shape_cast %8 : vector<2x8xf32> to vector<2x8x1xf32>
    %cst_4 = arith.constant 3.200000e+01 : f32
    %10 = vector.broadcast %cst_4 : f32 to vector<2x8x1xf32>
    %11 = arith.divf %9, %10 : vector<2x8x1xf32>
    %12 = vector.broadcast %4 : vector<2x8x1xf32> to vector<2x8x32xf32>
    %13 = arith.subf %0, %12 : vector<2x8x32xf32>
    %cst_5 = arith.constant 9.99999974E-6 : f32
    %14 = vector.broadcast %cst_5 : f32 to vector<2x8x1xf32>
    %15 = arith.addf %11, %14 : vector<2x8x1xf32>
    %16 = math.rsqrt %15 : vector<2x8x1xf32>
    %17 = vector.broadcast %16 : vector<2x8x1xf32> to vector<2x8x32xf32>
    %18 = arith.mulf %13, %17 : vector<2x8x32xf32>
    %19 = vector.shape_cast %18 : vector<2x8x32xf32> to vector<2x1x8x32xf32>
    %20 = vector.shape_cast %19 : vector<2x1x8x32xf32> to vector<2x1x8x32xf32>
    %21 = vector.broadcast %20 : vector<2x1x8x32xf32> to vector<2x4x8x32xf32>
    %22 = vector.shape_cast %21 : vector<2x4x8x32xf32> to vector<8x8x32xf32>
    %c0_6 = arith.constant 0 : index
    %c0_7 = arith.constant 0 : index
    %c0_8 = arith.constant 0 : index
    %c0_9 = arith.constant 0 : index
    %23 = vector.load %arg2[%c0_6, %c0_7, %c0_8, %c0_9] : memref<3x8x32x8xf32, #tpu.memory_space<vmem>>, vector<1x8x32x8xf32>
    %24 = vector.shape_cast %23 : vector<1x8x32x8xf32> to vector<8x32x8xf32>
    %c1 = arith.constant 1 : index
    %c0_10 = arith.constant 0 : index
    %c0_11 = arith.constant 0 : index
    %c0_12 = arith.constant 0 : index
    %25 = vector.load %arg2[%c1, %c0_10, %c0_11, %c0_12] : memref<3x8x32x8xf32, #tpu.memory_space<vmem>>, vector<1x8x32x8xf32>
    %26 = vector.shape_cast %25 : vector<1x8x32x8xf32> to vector<8x32x8xf32>
    %c2 = arith.constant 2 : index
    %c0_13 = arith.constant 0 : index
    %c0_14 = arith.constant 0 : index
    %c0_15 = arith.constant 0 : index
    %27 = vector.load %arg2[%c2, %c0_13, %c0_14, %c0_15] : memref<3x8x32x8xf32, #tpu.memory_space<vmem>>, vector<1x8x32x8xf32>
    %28 = vector.shape_cast %27 : vector<1x8x32x8xf32> to vector<8x32x8xf32>
    "tpu.trace_start"() <{level = 10 : i32, message = "gnd,gde->gne"}> : () -> ()
    %cst_16 = arith.constant dense<0.000000e+00> : vector<8x8x8xf32>
    %29 = tpu.matmul %22, %24, %cst_16 {dimension_numbers = #tpu.dot_dimension_numbers<[2], [1], [1], [2], [0, 0, 0, 1, 1, 2], [0], [0]>} : vector<8x8x32xf32>, vector<8x32x8xf32>, vector<8x8x8xf32> -> vector<8x8x8xf32>
    "tpu.trace_stop"() : () -> ()
    %c0_17 = arith.constant 0 : index
    %c0_18 = arith.constant 0 : index
    %c0_19 = arith.constant 0 : index
    %30 = vector.load %arg3[%c0_17, %c0_18, %c0_19] : memref<8x1x8xf32, #tpu.memory_space<vmem>>, vector<8x1x8xf32>
    %31 = vector.broadcast %30 : vector<8x1x8xf32> to vector<8x8x8xf32>
    %32 = arith.addf %29, %31 : vector<8x8x8xf32>
    "tpu.trace_start"() <{level = 10 : i32, message = "gnd,gde->gne"}> : () -> ()
    %cst_20 = arith.constant dense<0.000000e+00> : vector<8x8x8xf32>
    %33 = tpu.matmul %22, %26, %cst_20 {dimension_numbers = #tpu.dot_dimension_numbers<[2], [1], [1], [2], [0, 0, 0, 1, 1, 2], [0], [0]>} : vector<8x8x32xf32>, vector<8x32x8xf32>, vector<8x8x8xf32> -> vector<8x8x8xf32>
    %cst_21 = arith.constant dense<0.000000e+00> : vector<8x8x8xf32>
    %34 = tpu.matmul %22, %28, %cst_21 {dimension_numbers = #tpu.dot_dimension_numbers<[2], [1], [1], [2], [0, 0, 0, 1, 1, 2], [0], [0]>} : vector<8x8x32xf32>, vector<8x32x8xf32>, vector<8x8x8xf32> -> vector<8x8x8xf32>
    "tpu.trace_stop"() : () -> ()
    %c0_22 = arith.constant 0 : index
    %c0_23 = arith.constant 0 : index
    %c0_24 = arith.constant 0 : index
    %35 = vector.load %arg4[%c0_22, %c0_23, %c0_24] : memref<8x1x8xf32, #tpu.memory_space<vmem>>, vector<8x1x8xf32>
    %36 = vector.broadcast %35 : vector<8x1x8xf32> to vector<8x8x8xf32>
    %37 = arith.addf %34, %36 : vector<8x8x8xf32>
    "tpu.trace_start"() <{level = 10 : i32, message = "gne,gme->gnm"}> : () -> ()
    %cst_25 = arith.constant dense<0.000000e+00> : vector<8x8x8xf32>
    %38 = tpu.matmul %32, %33, %cst_25 {dimension_numbers = #tpu.dot_dimension_numbers<[2], [2], [1], [1], [0, 0, 0, 1, 1, 1], [0], [0]>} : vector<8x8x8xf32>, vector<8x8x8xf32>, vector<8x8x8xf32> -> vector<8x8x8xf32>
    "tpu.trace_stop"() : () -> ()
    %cst_26 = arith.constant dense<0xFF800000> : vector<8x8xf32>
    %39 = vector.multi_reduction <maximumf>, %38, %cst_26 [2] : vector<8x8x8xf32> to vector<8x8xf32>
    %40 = vector.shape_cast %39 : vector<8x8xf32> to vector<8x8x1xf32>
    %41 = vector.broadcast %40 : vector<8x8x1xf32> to vector<8x8x8xf32>
    %42 = arith.subf %38, %41 : vector<8x8x8xf32>
    %43 = math.exp %42 : vector<8x8x8xf32>
    %cst_27 = arith.constant dense<0.000000e+00> : vector<8x8xf32>
    %44 = vector.multi_reduction <add>, %43, %cst_27 [2] : vector<8x8x8xf32> to vector<8x8xf32>
    %45 = vector.shape_cast %44 : vector<8x8xf32> to vector<8x8x1xf32>
    %46 = tpu.reciprocal %45 {approx = true} : vector<8x8x1xf32> -> vector<8x8x1xf32>
    %47 = arith.mulf %45, %46 : vector<8x8x1xf32>
    %cst_28 = arith.constant 2.000000e+00 : f32
    %48 = vector.broadcast %cst_28 : f32 to vector<8x8x1xf32>
    %49 = arith.subf %48, %47 : vector<8x8x1xf32>
    %50 = arith.mulf %46, %49 : vector<8x8x1xf32>
    %51 = vector.broadcast %50 : vector<8x8x1xf32> to vector<8x8x8xf32>
    %52 = arith.mulf %43, %51 : vector<8x8x8xf32>
    "tpu.trace_start"() <{level = 10 : i32, message = "gnm,gme->gne"}> : () -> ()
    %cst_29 = arith.constant dense<0.000000e+00> : vector<8x8x8xf32>
    %53 = tpu.matmul %52, %37, %cst_29 {dimension_numbers = #tpu.dot_dimension_numbers<[2], [1], [1], [2], [0, 0, 0, 1, 1, 2], [0], [0]>} : vector<8x8x8xf32>, vector<8x8x8xf32>, vector<8x8x8xf32> -> vector<8x8x8xf32>
    "tpu.trace_stop"() : () -> ()
    %c0_30 = arith.constant 0 : index
    %c0_31 = arith.constant 0 : index
    %c0_32 = arith.constant 0 : index
    %54 = vector.load %arg5[%c0_30, %c0_31, %c0_32] : memref<8x8x32xf32, #tpu.memory_space<vmem>>, vector<8x8x32xf32>
    "tpu.trace_start"() <{level = 10 : i32, message = "gne,ged->gnd"}> : () -> ()
    %cst_33 = arith.constant dense<0.000000e+00> : vector<8x8x32xf32>
    %55 = tpu.matmul %53, %54, %cst_33 {dimension_numbers = #tpu.dot_dimension_numbers<[2], [1], [1], [2], [0, 0, 0, 1, 1, 2], [0], [0]>} : vector<8x8x8xf32>, vector<8x8x32xf32>, vector<8x8x32xf32> -> vector<8x8x32xf32>
    "tpu.trace_stop"() : () -> ()
    %56 = vector.shape_cast %55 : vector<8x8x32xf32> to vector<2x4x8x32xf32>
    %cst_34 = arith.constant dense<0.000000e+00> : vector<2x8x32xf32>
    %57 = vector.multi_reduction <add>, %56, %cst_34 [1] : vector<2x4x8x32xf32> to vector<2x8x32xf32>
    %c0_35 = arith.constant 0 : index
    %c0_36 = arith.constant 0 : index
    %c0_37 = arith.constant 0 : index
    %58 = vector.load %arg6[%c0_35, %c0_36, %c0_37] : memref<2x8x32xf32, #tpu.memory_space<vmem>>, vector<2x8x32xf32>
    tpu.vector_store %arg6[%c0_35, %c0_36, %c0_37], %57 {strides = array<i32>} : memref<2x8x32xf32, #tpu.memory_space<vmem>>, vector<2x8x32xf32>,
    return
  }
  func.func @transform_0(%arg0: i32) -> (i32, i32, i32) {
    %c0_i32 = arith.constant 0 : i32
    %c0_i32_0 = arith.constant 0 : i32
    %c0_i32_1 = arith.constant 0 : i32
    return %arg0, %c0_i32, %c0_i32_0 : i32, i32, i32
  }
  func.func @transform_1(%arg0: i32) -> (i32, i32, i32, i32) {
    %c0_i32 = arith.constant 0 : i32
    %c0_i32_0 = arith.constant 0 : i32
    %c0_i32_1 = arith.constant 0 : i32
    %c0_i32_2 = arith.constant 0 : i32
    %c0_i32_3 = arith.constant 0 : i32
    return %c0_i32, %c0_i32_0, %c0_i32_1, %c0_i32_2 : i32, i32, i32, i32
  }
  func.func @transform_2(%arg0: i32) -> (i32, i32, i32) {
    %c0_i32 = arith.constant 0 : i32
    %c0_i32_0 = arith.constant 0 : i32
    %c0_i32_1 = arith.constant 0 : i32
    %c0_i32_2 = arith.constant 0 : i32
    return %c0_i32, %c0_i32_0, %c0_i32_1 : i32, i32, i32
  }
  func.func @transform_3(%arg0: i32) -> (i32, i32, i32) {
    %c0_i32 = arith.constant 0 : i32
    %c0_i32_0 = arith.constant 0 : i32
    %c0_i32_1 = arith.constant 0 : i32
    %c0_i32_2 = arith.constant 0 : i32
    return %c0_i32, %c0_i32_0, %c0_i32_1 : i32, i32, i32
  }
  func.func @transform_4(%arg0: i32) -> (i32, i32, i32) {
    %c0_i32 = arith.constant 0 : i32
    %c0_i32_0 = arith.constant 0 : i32
    %c0_i32_1 = arith.constant 0 : i32
    %c0_i32_2 = arith.constant 0 : i32
    return %c0_i32, %c0_i32_0, %c0_i32_1 : i32, i32, i32
  }
  func.func @transform_5(%arg0: i32) -> (i32, i32, i32) {
    %c0_i32 = arith.constant 0 : i32
    %c0_i32_0 = arith.constant 0 : i32
    %c0_i32_1 = arith.constant 0 : i32
    return %arg0, %c0_i32, %c0_i32_0 : i32, i32, i32
  }
}

</mosaic_0001>

<bundles_post_ra>
// kernel: tpu_custom_call.1
= control target key start
LH: loop header
LB: loop body
LE: loop exit
PB: predicated region body
PF: predicated region fallthrough
CT: control target
= control target key end

     0   :  { %vm23_vm0 = vcmask 261120   ;;  %s5408_s0 = inlined_call_operand.vmem [shape: f32[2,8,32], index: 0, kind: input, shape index: {}]   ;;  %s5409_s1 = inlined_call_operand.vmem [shape: f32[3,8,32,8], index: 1, kind: input, shape index: {}]   ;;  %s5410_s2 = inlined_call_operand.vmem [shape: f32[8,1,8], index: 2, kind: input, shape index: {}]   ;;  %s5411_s3 = inlined_call_operand.vmem [shape: f32[8,1,8], index: 3, kind: input, shape index: {}]   ;;  %s5412_s4 = inlined_call_operand.vmem [shape: f32[8,8,32], index: 4, kind: input, shape index: {}]   ;;  %s5413_s5 = inlined_call_operand.hbm [shape: f32[2,8,32], index: 5, kind: output, shape index: {}]  }
   0x1   :  { %v21_v0 = vld [vmem:[%s5408_s0] sm:$0xff]  ;;  %v22_v1 = vld [vmem:[%s5408_s0 + $0x8] sm:$0xff] }
   0x2   :  { %10 = vsyncpa [#allocation3], 0  ;;  %v24_v2 = vsel %vm23_vm0, %v21_v0, 0.0  ;;  %v27_v3 = vsel %vm23_vm0, %v22_v1, 0.0  ;;  %v4627_v14 = vmov 0.0   ;;  %v54_v15 = vld [vmem:[%s5409_s1 + $0x18] sm:$0xff] }
   0x3   :  { %25 = vadd.xlane.f32.xlu0 %v24_v2  ;;  %4180 = vmatprep.subr.mxu0 %v4627_v14  ;;  %v58_v16 = vld [vmem:[%s5409_s1 + $0x38] sm:$0xff]  ;;  %v53_v17 = vld [vmem:[%s5409_s1 + $0x10] sm:$0xff]  ;;  %v52_v19 = vld [vmem:[%s5409_s1 + $0x8] sm:$0xff]  ;;  %vm4628_vm1 = vmmov 0   ;;  %vm1947_vm2 = vcmask 64512  }
   0x4   :  { %4191 = vmatprep.subr.mxu1 %v4627_v14  ;;  %4181 = vmatpush3.msra.mxu0 %v54_v15  ;;  %v57_v18 = vld [vmem:[%s5409_s1 + $0x30] sm:$0xff]  ;;  %v56_v20 = vld [vmem:[%s5409_s1 + $0x28] sm:$0xff]  ;;  %v51_v21 = vld [vmem:[%s5409_s1] sm:$0xff] }
   0x5   :  { %4192 = vmatpush3.msra.mxu1 %v58_v16  ;;  %4182 = vmatprep.subr.mxu0 %v4627_v14  ;;  %v55_v22 = vld [vmem:[%s5409_s1 + $0x20] sm:$0xff]  ;;  %v62_v31 = vld [vmem:[%s5409_s1 + $0x58] sm:$0xff]  ;;  %v61_v33 = vld [vmem:[%s5409_s1 + $0x50] sm:$0xff] }
   0x6   :  { %4193 = vmatprep.subr.mxu1 %v4627_v14  ;;  %4183 = vmatpush3.msra.mxu0 %v53_v17  ;;  %v66_v32 = vld [vmem:[%s5409_s1 + $0x78] sm:$0xff]  ;;  %v65_v34 = vld [vmem:[%s5409_s1 + $0x70] sm:$0xff]  ;;  %v60_v35 = vld [vmem:[%s5409_s1 + $0x48] sm:$0xff] }
   0x7   :  { %28 = vadd.xlane.f32.xlu0 %v27_v3  ;;  %4194 = vmatpush3.msra.mxu1 %v57_v18  ;;  %v64_v36 = vld [vmem:[%s5409_s1 + $0x68] sm:$0xff]  ;;  %v59_v37 = vld [vmem:[%s5409_s1 + $0x40] sm:$0xff]  ;;  %v70_v39 = vld [vmem:[%s5409_s1 + $0x98] sm:$0xff] }
   0x8   :  { %4184 = vmatprep.subr.mxu0 %v4627_v14  ;;  %4195 = vmatprep.subr.mxu1 %v4627_v14  ;;  %v63_v38 = vld [vmem:[%s5409_s1 + $0x60] sm:$0xff]  ;;  %v74_v40 = vld [vmem:[%s5409_s1 + $0xb8] sm:$0xff]  ;;  %v69_v41 = vld [vmem:[%s5409_s1 + $0x90] sm:$0xff] }
   0x9   :  { %4185 = vmatpush3.msra.mxu0 %v52_v19  ;;  %4196 = vmatpush3.msra.mxu1 %v56_v20  ;;  %v73_v42 = vld [vmem:[%s5409_s1 + $0xb0] sm:$0xff]  ;;  %v68_v43 = vld [vmem:[%s5409_s1 + $0x88] sm:$0xff]  ;;  %v67_v46 = vld [vmem:[%s5409_s1 + $0x80] sm:$0xff] }
   0xa   :  { %4186 = vmatprep.subr.mxu0 %v4627_v14  ;;  %4197 = vmatprep.subr.mxu1 %v4627_v14  ;;  %v72_v44 = vld [vmem:[%s5409_s1 + $0xa8] sm:$0xff]  ;;  %v71_v47 = vld [vmem:[%s5409_s1 + $0xa0] sm:$0xff]  ;;  %v78_v49 = vld [vmem:[%s5409_s1 + $0xd8] sm:$0xff] }
   0xb   :  { %4187 = vmatpush3.msra.mxu0 %v51_v21  ;;  %4198 = vmatpush3.msra.mxu1 %v55_v22  ;;  %v82_v50 = vld [vmem:[%s5409_s1 + $0xf8] sm:$0xff]  ;;  %v77_v51 = vld [vmem:[%s5409_s1 + $0xd0] sm:$0xff]  ;;  %v76_v53 = vld [vmem:[%s5409_s1 + $0xc8] sm:$0xff] }
   0xc   :  { %4188 = vmatprep.mubr.msk.f32.mxu0 %vm4628_vm1, %v4627_v14  ;;  %4199 = vmatprep.mubr.msk.f32.mxu1 %vm4628_vm1, %v4627_v14  ;;  %v81_v52 = vld [vmem:[%s5409_s1 + $0xf0] sm:$0xff]  ;;  %v80_v54 = vld [vmem:[%s5409_s1 + $0xe8] sm:$0xff]  ;;  %v75_v55 = vld [vmem:[%s5409_s1 + $0xc0] sm:$0xff] }
   0xd   :  { %4202 = vmatprep.subr.mxu0 %v4627_v14  ;;  %4213 = vmatprep.subr.mxu1 %v4627_v14  ;;  %v79_v56 = vld [vmem:[%s5409_s1 + $0xe0] sm:$0xff]  ;;  %v3879_v57 = vld [vmem:[%s5409_s1 + $0x118] sm:$0xff]  ;;  %v3878_v59 = vld [vmem:[%s5409_s1 + $0x110] sm:$0xff] }
   0xe   :  { %v3883_v58 = vld [vmem:[%s5409_s1 + $0x138] sm:$0xff]  ;;  %v3882_v60 = vld [vmem:[%s5409_s1 + $0x130] sm:$0xff]  ;;  %v3877_v61 = vld [vmem:[%s5409_s1 + $0x108] sm:$0xff] }
   0xf   :  { %v3881_v62 = vld [vmem:[%s5409_s1 + $0x128] sm:$0xff]  ;;  %v3876_v63 = vld [vmem:[%s5409_s1 + $0x100] sm:$0xff]  ;;  %v3891_v2 = vld [vmem:[%s5409_s1 + $0x178] sm:$0xff] }
  0x10   :  { %v3886_v3 = vld [vmem:[%s5409_s1 + $0x150] sm:$0xff]  ;;  %v3897_v15 = vld [vmem:[%s5409_s1 + $0x1a8] sm:$0xff]  ;;  %v3892_v16 = vld [vmem:[%s5409_s1 + $0x180] sm:$0xff] }
  0x11   :  { %v3896_v17 = vld [vmem:[%s5409_s1 + $0x1a0] sm:$0xff]  ;;  %v3903_v18 = vld [vmem:[%s5409_s1 + $0x1d8] sm:$0xff]  ;;  %v3902_v20 = vld [vmem:[%s5409_s1 + $0x1d0] sm:$0xff] }
  0x12   :  { %v3907_v19 = vld [vmem:[%s5409_s1 + $0x1f8] sm:$0xff]  ;;  %v3906_v21 = vld [vmem:[%s5409_s1 + $0x1f0] sm:$0xff]  ;;  %v3901_v22 = vld [vmem:[%s5409_s1 + $0x1c8] sm:$0xff] }
  0x8c   :  { %v26_v4 = vpop.xlane.xlu0 %25 }
  0x8d   :  { %v31_v5 = vmul.f32 0.03125, %v26_v4  ;;  %v3890_v4 = vld [vmem:[%s5409_s1 + $0x170] sm:$0xff] }
  0x8f   :  { %v33_v6 = vsub.f32 %v21_v0, %v31_v5  ;;  %v3880_v0 = vld [vmem:[%s5409_s1 + $0x120] sm:$0xff]  ;;  %v3885_v5 = vld [vmem:[%s5409_s1 + $0x148] sm:$0xff] }
  0x90   :  { %v29_v7 = vpop.xlane.xlu0 %28 }
  0x91   :  { %v32_v8 = vmul.f32 0.03125, %v29_v7  ;;  %v35_v9 = vmul.f32 %v33_v6, %v33_v6  ;;  %v3884_v7 = vld [vmem:[%s5409_s1 + $0x140] sm:$0xff] }
  0x93   :  { %v4670_v10 = vsub.f32 %v22_v1, %v32_v8  ;;  %v37_v11 = vsel %vm23_vm0, %v35_v9, 0.0  ;;  %v3887_v1 = vld [vmem:[%s5409_s1 + $0x158] sm:$0xff]  ;;  %v3888_v8 = vld [vmem:[%s5409_s1 + $0x160] sm:$0xff] }
  0x94   :  { %38 = vadd.xlane.f32.xlu1 %v37_v11  ;;  %v3895_v9 = vld [vmem:[%s5409_s1 + $0x198] sm:$0xff]  ;;  %v3894_v11 = vld [vmem:[%s5409_s1 + $0x190] sm:$0xff] }
  0x95   :  { %v36_v12 = vmul.f32 %v4670_v10, %v4670_v10 }
  0x97   :  { %v40_v13 = vsel %vm23_vm0, %v36_v12, 0.0  ;;  %v3898_v12 = vld [vmem:[%s5409_s1 + $0x1b0] sm:$0xff] }
  0x98   :  { %41 = vadd.xlane.f32.xlu1 %v40_v13  ;;  %v3893_v13 = vld [vmem:[%s5409_s1 + $0x188] sm:$0xff] }
 0x11d   :  { %v39_v23 = vpop.xlane.xlu1 %38 }
 0x11e   :  { %v43_v24 = vmul.f32 0.03125, %v39_v23  ;;  %v3905_v23 = vld [vmem:[%s5409_s1 + $0x1e8] sm:$0xff] }
 0x120   :  { %v45_v25 = vadd.f32 1e-05, %v43_v24  ;;  %v3900_v24 = vld [vmem:[%s5409_s1 + $0x1c0] sm:$0xff] }
 0x121   :  { %v42_v26 = vpop.xlane.xlu1 %41 }
 0x122   :  { %4569 = vrsqrt.f32 %v45_v25  ;;  %v44_v27 = vmul.f32 0.03125, %v42_v26  ;;  %v3904_v25 = vld [vmem:[%s5409_s1 + $0x1e0] sm:$0xff]  ;;  %v3911_v26 = vld [vmem:[%s5409_s1 + $0x218] sm:$0xff] }
 0x124   :  { %v46_v29 = vadd.f32 1e-05, %v44_v27  ;;  %v3915_v27 = vld [vmem:[%s5409_s1 + $0x238] sm:$0xff] }
 0x126   :  { %4571 = vrsqrt.f32 %v46_v29  ;;  %v3914_v29 = vld [vmem:[%s5409_s1 + $0x230] sm:$0xff] }
 0x12f   :  { %v4570_v28 = vpop.eup %4569 }
 0x130   :  { %v4714_v30 = vmul.f32 %v4570_v28, %v33_v6  ;;  %v3889_v6 = vld [vmem:[%s5409_s1 + $0x168] sm:$0xff]  ;;  %v3910_v28 = vld [vmem:[%s5409_s1 + $0x210] sm:$0xff] }
 0x132   :  { %4189 = vmatmul.mubr.msk.f32.vlgmr.msra.gmra.mxu0 %vm23_vm0, %v4714_v30  ;;  %4200 = vmatmul.mubr.msk.f32.vlgmr.msra.gmra.mxu1 %vm23_vm0, %v4714_v30 }
 0x133   :  { %4203 = vmatpush3.msra.mxu0 %v62_v31  ;;  %4214 = vmatpush3.msra.mxu1 %v66_v32  ;;  %v4572_v45 = vpop.eup %4571  ;;  %v3909_v31 = vld [vmem:[%s5409_s1 + $0x208] sm:$0xff] }
 0x134   :  { %4204 = vmatprep.subr.mxu0 %v4627_v14  ;;  %4215 = vmatprep.subr.mxu1 %v4627_v14  ;;  %v4791_v48 = vmul.f32 %v4572_v45, %v4670_v10  ;;  %v3899_v10 = vld [vmem:[%s5409_s1 + $0x1b8] sm:$0xff]  ;;  %v3913_v32 = vld [vmem:[%s5409_s1 + $0x228] sm:$0xff]  ;;  %v3926_v45 = vld [vmem:[%s5409_s1 + $0x290] sm:$0xff] }
 0x135   :  { %4205 = vmatpush3.msra.mxu0 %v61_v33  ;;  %4216 = vmatpush3.msra.mxu1 %v65_v34  ;;  %v3908_v33 = vld [vmem:[%s5409_s1 + $0x200] sm:$0xff] }
 0x136   :  { %4206 = vmatprep.subr.mxu0 %v4627_v14  ;;  %4217 = vmatprep.subr.mxu1 %v4627_v14  ;;  %v3912_v34 = vld [vmem:[%s5409_s1 + $0x220] sm:$0xff] }
 0x137   :  { %4207 = vmatpush3.msra.mxu0 %v60_v35  ;;  %4218 = vmatpush3.msra.mxu1 %v64_v36  ;;  %v3919_v35 = vld [vmem:[%s5409_s1 + $0x258] sm:$0xff] }
 0x138   :  { %4208 = vmatprep.subr.mxu0 %v4627_v14  ;;  %4219 = vmatprep.subr.mxu1 %v4627_v14  ;;  %v3923_v36 = vld [vmem:[%s5409_s1 + $0x278] sm:$0xff] }
 0x139   :  { %4209 = vmatpush3.msra.mxu0 %v59_v37  ;;  %4210 = vmatprep.mubr.msk.f32.mxu0 %vm4628_vm1, %v4627_v14  ;;  %v3918_v37 = vld [vmem:[%s5409_s1 + $0x250] sm:$0xff] }
 0x13a   :  { %4220 = vmatpush3.msra.mxu1 %v63_v38  ;;  %4221 = vmatprep.mubr.msk.f32.mxu1 %vm4628_vm1, %v4627_v14  ;;  %v3922_v38 = vld [vmem:[%s5409_s1 + $0x270] sm:$0xff] }
 0x13b   :  { %4211 = vmatmul.mubr.msk.f32.vlgmr.msra.gmra.mxu0 %vm23_vm0, %v4714_v30  ;;  %4222 = vmatmul.mubr.msk.f32.vlgmr.msra.gmra.mxu1 %vm23_vm0, %v4714_v30 }
 0x13c   :  { %4224 = vmatprep.subr.mxu0 %v4627_v14  ;;  %4235 = vmatprep.subr.mxu1 %v4627_v14 }
 0x13d   :  { %4225 = vmatpush3.msra.mxu0 %v70_v39  ;;  %4236 = vmatpush3.msra.mxu1 %v74_v40  ;;  %v3917_v39 = vld [vmem:[%s5409_s1 + $0x248] sm:$0xff] }
 0x13e   :  { %4226 = vmatprep.subr.mxu0 %v4627_v14  ;;  %4237 = vmatprep.subr.mxu1 %v4627_v14  ;;  %v3921_v40 = vld [vmem:[%s5409_s1 + $0x268] sm:$0xff] }
 0x13f   :  { %4227 = vmatpush3.msra.mxu0 %v69_v41  ;;  %4238 = vmatpush3.msra.mxu1 %v73_v42  ;;  %v3916_v41 = vld [vmem:[%s5409_s1 + $0x240] sm:$0xff] }
 0x140   :  { %4228 = vmatprep.subr.mxu0 %v4627_v14  ;;  %4239 = vmatprep.subr.mxu1 %v4627_v14  ;;  %v3920_v42 = vld [vmem:[%s5409_s1 + $0x260] sm:$0xff] }
 0x141   :  { %4229 = vmatpush3.msra.mxu0 %v68_v43  ;;  %4240 = vmatpush3.msra.mxu1 %v72_v44  ;;  %v3927_v43 = vld [vmem:[%s5409_s1 + $0x298] sm:$0xff] }
 0x142   :  { %4230 = vmatprep.subr.mxu0 %v4627_v14  ;;  %4241 = vmatprep.subr.mxu1 %v4627_v14  ;;  %v3931_v44 = vld [vmem:[%s5409_s1 + $0x2b8] sm:$0xff] }
 0x143   :  { %4231 = vmatpush3.msra.mxu0 %v67_v46  ;;  %4232 = vmatprep.mubr.msk.f32.mxu0 %vm4628_vm1, %v4627_v14  ;;  %v3930_v46 = vld [vmem:[%s5409_s1 + $0x2b0] sm:$0xff] }
 0x144   :  { %4242 = vmatpush3.msra.mxu1 %v71_v47  ;;  %4243 = vmatprep.mubr.msk.f32.mxu1 %vm4628_vm1, %v4627_v14  ;;  %v3929_v47 = vld [vmem:[%s5409_s1 + $0x2a8] sm:$0xff] }
 0x145   :  { %4233 = vmatmul.mubr.msk.f32.vlgmr.msra.gmra.mxu0 %vm23_vm0, %v4791_v48  ;;  %4244 = vmatmul.mubr.msk.f32.vlgmr.msra.gmra.mxu1 %vm23_vm0, %v4791_v48 }
 0x146   :  { %4246 = vmatprep.subr.mxu0 %v4627_v14  ;;  %4257 = vmatprep.subr.mxu1 %v4627_v14 }
 0x147   :  { %4247 = vmatpush3.msra.mxu0 %v78_v49  ;;  %4258 = vmatpush3.msra.mxu1 %v82_v50  ;;  %v3924_v49 = vld [vmem:[%s5409_s1 + $0x280] sm:$0xff] }
 0x148   :  { %4248 = vmatprep.subr.mxu0 %v4627_v14  ;;  %4259 = vmatprep.subr.mxu1 %v4627_v14  ;;  %v3928_v50 = vld [vmem:[%s5409_s1 + $0x2a0] sm:$0xff] }
 0x149   :  { %4249 = vmatpush3.msra.mxu0 %v77_v51  ;;  %4260 = vmatpush3.msra.mxu1 %v81_v52  ;;  %v3935_v51 = vld [vmem:[%s5409_s1 + $0x2d8] sm:$0xff] }
 0x14a   :  { %4250 = vmatprep.subr.mxu0 %v4627_v14  ;;  %4261 = vmatprep.subr.mxu1 %v4627_v14  ;;  %v3939_v52 = vld [vmem:[%s5409_s1 + $0x2f8] sm:$0xff] }
 0x14b   :  { %4251 = vmatpush3.msra.mxu0 %v76_v53  ;;  %4262 = vmatpush3.msra.mxu1 %v80_v54  ;;  %v3934_v53 = vld [vmem:[%s5409_s1 + $0x2d0] sm:$0xff] }
 0x14c   :  { %4252 = vmatprep.subr.mxu0 %v4627_v14  ;;  %4263 = vmatprep.subr.mxu1 %v4627_v14  ;;  %v3938_v54 = vld [vmem:[%s5409_s1 + $0x2f0] sm:$0xff] }
 0x14d   :  { %4253 = vmatpush3.msra.mxu0 %v75_v55  ;;  %4254 = vmatprep.mubr.msk.f32.mxu0 %vm4628_vm1, %v4627_v14  ;;  %v3933_v55 = vld [vmem:[%s5409_s1 + $0x2c8] sm:$0xff] }
 0x14e   :  { %4264 = vmatpush3.msra.mxu1 %v79_v56  ;;  %4265 = vmatprep.mubr.msk.f32.mxu1 %vm4628_vm1, %v4627_v14  ;;  %v3937_v56 = vld [vmem:[%s5409_s1 + $0x2e8] sm:$0xff] }
 0x14f   :  { %4255 = vmatmul.mubr.msk.f32.vlgmr.msra.gmra.mxu0 %vm23_vm0, %v4791_v48  ;;  %4266 = vmatmul.mubr.msk.f32.vlgmr.msra.gmra.mxu1 %vm23_vm0, %v4791_v48 }
 0x150   :  { %4268 = vmatprep.subr.mxu0 %v4627_v14  ;;  %4279 = vmatprep.subr.mxu1 %v4627_v14 }
 0x151   :  { %4269 = vmatpush3.msra.mxu0 %v3879_v57  ;;  %4280 = vmatpush3.msra.mxu1 %v3883_v58  ;;  %v3932_v57 = vld [vmem:[%s5409_s1 + $0x2c0] sm:$0xff] }
 0x152   :  { %4270 = vmatprep.subr.mxu0 %v4627_v14  ;;  %4281 = vmatprep.subr.mxu1 %v4627_v14  ;;  %v3936_v58 = vld [vmem:[%s5409_s1 + $0x2e0] sm:$0xff] }
 0x153   :  { %4271 = vmatpush3.msra.mxu0 %v3878_v59  ;;  %4282 = vmatpush3.msra.mxu1 %v3882_v60 }
 0x154   :  { %4272 = vmatprep.subr.mxu0 %v4627_v14  ;;  %4283 = vmatprep.subr.mxu1 %v4627_v14 }
 0x155   :  { %4273 = vmatpush3.msra.mxu0 %v3877_v61  ;;  %4284 = vmatpush3.msra.mxu1 %v3881_v62 }
 0x156   :  { %4274 = vmatprep.subr.mxu0 %v4627_v14  ;;  %4285 = vmatprep.subr.mxu1 %v4627_v14 }
 0x157   :  { %4275 = vmatpush3.msra.mxu0 %v3876_v63  ;;  %4276 = vmatprep.mubr.msk.f32.mxu0 %vm4628_vm1, %v4627_v14 }
 0x158   :  { %4286 = vmatpush3.msra.mxu1 %v3880_v0  ;;  %4287 = vmatprep.mubr.msk.f32.mxu1 %vm4628_vm1, %v4627_v14 }
 0x159   :  { %4277 = vmatmul.mubr.msk.f32.vlgmr.msra.gmra.mxu0 %vm23_vm0, %v4714_v30  ;;  %4288 = vmatmul.mubr.msk.f32.vlgmr.msra.gmra.mxu1 %vm23_vm0, %v4714_v30 }
 0x15a   :  { %4290 = vmatprep.subr.mxu0 %v4627_v14  ;;  %4301 = vmatprep.subr.mxu1 %v4627_v14 }
 0x15b   :  { %4291 = vmatpush3.msra.mxu0 %v3887_v1  ;;  %4302 = vmatpush3.msra.mxu1 %v3891_v2 }
 0x15c   :  { %4292 = vmatprep.subr.mxu0 %v4627_v14  ;;  %4303 = vmatprep.subr.mxu1 %v4627_v14 }
 0x15d   :  { %4293 = vmatpush3.msra.mxu0 %v3886_v3  ;;  %4304 = vmatpush3.msra.mxu1 %v3890_v4 }
 0x15e   :  { %4294 = vmatprep.subr.mxu0 %v4627_v14  ;;  %4305 = vmatprep.subr.mxu1 %v4627_v14 }
 0x15f   :  { %4295 = vmatpush3.msra.mxu0 %v3885_v5  ;;  %4306 = vmatpush3.msra.mxu1 %v3889_v6 }
 0x160   :  { %4296 = vmatprep.subr.mxu0 %v4627_v14  ;;  %4307 = vmatprep.subr.mxu1 %v4627_v14 }
 0x161   :  { %4297 = vmatpush3.msra.mxu0 %v3884_v7  ;;  %4298 = vmatprep.mubr.msk.f32.mxu0 %vm4628_vm1, %v4627_v14 }
 0x162   :  { %4308 = vmatpush3.msra.mxu1 %v3888_v8  ;;  %4309 = vmatprep.mubr.msk.f32.mxu1 %vm4628_vm1, %v4627_v14 }
 0x163   :  { %4299 = vmatmul.mubr.msk.f32.vlgmr.msra.gmra.mxu0 %vm23_vm0, %v4714_v30  ;;  %4310 = vmatmul.mubr.msk.f32.vlgmr.msra.gmra.mxu1 %vm23_vm0, %v4714_v30 }
 0x164   :  { %4312 = vmatprep.subr.mxu0 %v4627_v14  ;;  %4323 = vmatprep.subr.mxu1 %v4627_v14 }
 0x165   :  { %4313 = vmatpush3.msra.mxu0 %v3895_v9  ;;  %4324 = vmatpush3.msra.mxu1 %v3899_v10  ;;  %v3940_v10 = vld [vmem:[%s5410_s2] ss:$0 sm:$0xff] }
 0x166   :  { %4314 = vmatprep.subr.mxu0 %v4627_v14  ;;  %4325 = vmatprep.subr.mxu1 %v4627_v14 }
 0x167   :  { %4315 = vmatpush3.msra.mxu0 %v3894_v11  ;;  %4326 = vmatpush3.msra.mxu1 %v3898_v12  ;;  %v3941_v11 = vld [vmem:[%s5410_s2 + $0x1] ss:$0 sm:$0xff] }
 0x168   :  { %4316 = vmatprep.subr.mxu0 %v4627_v14  ;;  %4327 = vmatprep.subr.mxu1 %v4627_v14 }
 0x169   :  { %4317 = vmatpush3.msra.mxu0 %v3893_v13  ;;  %4328 = vmatpush3.msra.mxu1 %v3897_v15 }
 0x16a   :  { %4318 = vmatprep.subr.mxu0 %v4627_v14  ;;  %4329 = vmatprep.subr.mxu1 %v4627_v14 }
 0x16b   :  { %4319 = vmatpush3.msra.mxu0 %v3892_v16  ;;  %4320 = vmatprep.mubr.msk.f32.mxu0 %vm4628_vm1, %v4627_v14 }
 0x16c   :  { %4330 = vmatpush3.msra.mxu1 %v3896_v17  ;;  %4331 = vmatprep.mubr.msk.f32.mxu1 %vm4628_vm1, %v4627_v14 }
 0x16d   :  { %4321 = vmatmul.mubr.msk.f32.vlgmr.msra.gmra.mxu0 %vm23_vm0, %v4791_v48  ;;  %4332 = vmatmul.mubr.msk.f32.vlgmr.msra.gmra.mxu1 %vm23_vm0, %v4791_v48 }
 0x16e   :  { %4334 = vmatprep.subr.mxu0 %v4627_v14  ;;  %4345 = vmatprep.subr.mxu1 %v4627_v14 }
 0x16f   :  { %4335 = vmatpush3.msra.mxu0 %v3903_v18  ;;  %4346 = vmatpush3.msra.mxu1 %v3907_v19  ;;  %v3942_v19 = vld [vmem:[%s5410_s2 + $0x2] ss:$0 sm:$0xff] }
 0x170   :  { %4336 = vmatprep.subr.mxu0 %v4627_v14  ;;  %4347 = vmatprep.subr.mxu1 %v4627_v14 }
 0x171   :  { %4337 = vmatpush3.msra.mxu0 %v3902_v20  ;;  %4348 = vmatpush3.msra.mxu1 %v3906_v21  ;;  %v3943_v20 = vld [vmem:[%s5410_s2 + $0x3] ss:$0 sm:$0xff] }
 0x172   :  { %4338 = vmatprep.subr.mxu0 %v4627_v14  ;;  %4349 = vmatprep.subr.mxu1 %v4627_v14 }
 0x173   :  { %4339 = vmatpush3.msra.mxu0 %v3901_v22  ;;  %4350 = vmatpush3.msra.mxu1 %v3905_v23 }
 0x174   :  { %4340 = vmatprep.subr.mxu0 %v4627_v14  ;;  %4351 = vmatprep.subr.mxu1 %v4627_v14 }
 0x175   :  { %4341 = vmatpush3.msra.mxu0 %v3900_v24  ;;  %4342 = vmatprep.mubr.msk.f32.mxu0 %vm4628_vm1, %v4627_v14 }
 0x176   :  { %4352 = vmatpush3.msra.mxu1 %v3904_v25  ;;  %4353 = vmatprep.mubr.msk.f32.mxu1 %vm4628_vm1, %v4627_v14 }
 0x177   :  { %4343 = vmatmul.mubr.msk.f32.vlgmr.msra.gmra.mxu0 %vm23_vm0, %v4791_v48  ;;  %4354 = vmatmul.mubr.msk.f32.vlgmr.msra.gmra.mxu1 %vm23_vm0, %v4791_v48 }
 0x178   :  { %4356 = vmatprep.subr.mxu0 %v4627_v14  ;;  %4367 = vmatprep.subr.mxu1 %v4627_v14 }
 0x179   :  { %4357 = vmatpush3.msra.mxu0 %v3911_v26  ;;  %4368 = vmatpush3.msra.mxu1 %v3915_v27  ;;  %v3944_v27 = vld [vmem:[%s5410_s2 + $0x4] ss:$0 sm:$0xff] }
 0x17a   :  { %4358 = vmatprep.subr.mxu0 %v4627_v14  ;;  %4369 = vmatprep.subr.mxu1 %v4627_v14 }
 0x17b   :  { %4359 = vmatpush3.msra.mxu0 %v3910_v28  ;;  %4370 = vmatpush3.msra.mxu1 %v3914_v29  ;;  %v3945_v28 = vld [vmem:[%s5410_s2 + $0x5] ss:$0 sm:$0xff] }
 0x17c   :  { %4360 = vmatprep.subr.mxu0 %v4627_v14  ;;  %4371 = vmatprep.subr.mxu1 %v4627_v14 }
 0x17d   :  { %4361 = vmatpush3.msra.mxu0 %v3909_v31  ;;  %4372 = vmatpush3.msra.mxu1 %v3913_v32 }
 0x17e   :  { %4362 = vmatprep.subr.mxu0 %v4627_v14  ;;  %4373 = vmatprep.subr.mxu1 %v4627_v14 }
 0x17f   :  { %4363 = vmatpush3.msra.mxu0 %v3908_v33  ;;  %4364 = vmatprep.mubr.msk.f32.mxu0 %vm4628_vm1, %v4627_v14 }
 0x180   :  { %4374 = vmatpush3.msra.mxu1 %v3912_v34  ;;  %4375 = vmatprep.mubr.msk.f32.mxu1 %vm4628_vm1, %v4627_v14 }
 0x181   :  { %4365 = vmatmul.mubr.msk.f32.vlgmr.msra.gmra.mxu0 %vm23_vm0, %v4714_v30  ;;  %4376 = vmatmul.mubr.msk.f32.vlgmr.msra.gmra.mxu1 %vm23_vm0, %v4714_v30 }
 0x182   :  { %4378 = vmatprep.subr.mxu0 %v4627_v14  ;;  %4389 = vmatprep.subr.mxu1 %v4627_v14 }
 0x183   :  { %4379 = vmatpush3.msra.mxu0 %v3919_v35  ;;  %4390 = vmatpush3.msra.mxu1 %v3923_v36  ;;  %v3946_v36 = vld [vmem:[%s5410_s2 + $0x6] ss:$0 sm:$0xff] }
 0x184   :  { %4380 = vmatprep.subr.mxu0 %v4627_v14  ;;  %4391 = vmatprep.subr.mxu1 %v4627_v14 }
 0x185   :  { %4381 = vmatpush3.msra.mxu0 %v3918_v37  ;;  %4392 = vmatpush3.msra.mxu1 %v3922_v38  ;;  %v3947_v37 = vld [vmem:[%s5410_s2 + $0x7] ss:$0 sm:$0xff] }
 0x186   :  { %4382 = vmatprep.subr.mxu0 %v4627_v14  ;;  %4393 = vmatprep.subr.mxu1 %v4627_v14 }
 0x187   :  { %4383 = vmatpush3.msra.mxu0 %v3917_v39  ;;  %4394 = vmatpush3.msra.mxu1 %v3921_v40 }
 0x188   :  { %4384 = vmatprep.subr.mxu0 %v4627_v14  ;;  %4395 = vmatprep.subr.mxu1 %v4627_v14 }
 0x189   :  { %4385 = vmatpush3.msra.mxu0 %v3916_v41  ;;  %4386 = vmatprep.mubr.msk.f32.mxu0 %vm4628_vm1, %v4627_v14 }
 0x18a   :  { %4396 = vmatpush3.msra.mxu1 %v3920_v42  ;;  %4397 = vmatprep.mubr.msk.f32.mxu1 %vm4628_vm1, %v4627_v14 }
 0x18b   :  { %4387 = vmatmul.mubr.msk.f32.vlgmr.msra.gmra.mxu0 %vm23_vm0, %v4714_v30  ;;  %4398 = vmatmul.mubr.msk.f32.vlgmr.msra.gmra.mxu1 %vm23_vm0, %v4714_v30  ;;  %v3925_v30 = vld [vmem:[%s5409_s1 + $0x288] sm:$0xff] }
 0x18c   :  { %4400 = vmatprep.subr.mxu0 %v4627_v14  ;;  %4411 = vmatprep.subr.mxu1 %v4627_v14 }
 0x18d   :  { %4401 = vmatpush3.msra.mxu0 %v3927_v43  ;;  %4412 = vmatpush3.msra.mxu1 %v3931_v44  ;;  %v3964_v44 = vld [vmem:[%s5411_s3] ss:$0 sm:$0xff] }
 0x18e   :  { %4402 = vmatprep.subr.mxu0 %v4627_v14  ;;  %4413 = vmatprep.subr.mxu1 %v4627_v14 }
 0x18f   :  { %4403 = vmatpush3.msra.mxu0 %v3926_v45  ;;  %4414 = vmatpush3.msra.mxu1 %v3930_v46  ;;  %v3965_v45 = vld [vmem:[%s5411_s3 + $0x1] ss:$0 sm:$0xff] }
 0x190   :  { %4404 = vmatprep.subr.mxu0 %v4627_v14  ;;  %4415 = vmatprep.subr.mxu1 %v4627_v14 }
 0x191   :  { %4405 = vmatpush3.msra.mxu0 %v3925_v30  ;;  %4416 = vmatpush3.msra.mxu1 %v3929_v47 }
 0x192   :  { %4406 = vmatprep.subr.mxu0 %v4627_v14  ;;  %4417 = vmatprep.subr.mxu1 %v4627_v14 }
 0x193   :  { %4407 = vmatpush3.msra.mxu0 %v3924_v49  ;;  %4408 = vmatprep.mubr.msk.f32.mxu0 %vm4628_vm1, %v4627_v14 }
 0x194   :  { %4418 = vmatpush3.msra.mxu1 %v3928_v50  ;;  %4419 = vmatprep.mubr.msk.f32.mxu1 %vm4628_vm1, %v4627_v14 }
 0x195   :  { %4409 = vmatmul.mubr.msk.f32.vlgmr.msra.gmra.mxu0 %vm23_vm0, %v4791_v48  ;;  %4420 = vmatmul.mubr.msk.f32.vlgmr.msra.gmra.mxu1 %vm23_vm0, %v4791_v48 }
 0x196   :  { %4422 = vmatprep.subr.mxu0 %v4627_v14  ;;  %4433 = vmatprep.subr.mxu1 %v4627_v14 }
 0x197   :  { %4423 = vmatpush3.msra.mxu0 %v3935_v51  ;;  %4434 = vmatpush3.msra.mxu1 %v3939_v52 }
 0x198   :  { %4424 = vmatprep.subr.mxu0 %v4627_v14  ;;  %4435 = vmatprep.subr.mxu1 %v4627_v14 }
 0x199   :  { %4425 = vmatpush3.msra.mxu0 %v3934_v53  ;;  %4436 = vmatpush3.msra.mxu1 %v3938_v54 }
 0x19a   :  { %4426 = vmatprep.subr.mxu0 %v4627_v14  ;;  %4437 = vmatprep.subr.mxu1 %v4627_v14 }
 0x19b   :  { %4427 = vmatpush3.msra.mxu0 %v3933_v55  ;;  %4438 = vmatpush3.msra.mxu1 %v3937_v56 }
 0x19c   :  { %4428 = vmatprep.subr.mxu0 %v4627_v14  ;;  %4439 = vmatprep.subr.mxu1 %v4627_v14 }
 0x19d   :  { %4429 = vmatpush3.msra.mxu0 %v3932_v57  ;;  %4430 = vmatprep.mubr.msk.f32.mxu0 %vm4628_vm1, %v4627_v14 }
 0x19e   :  { %4440 = vmatpush3.msra.mxu1 %v3936_v58  ;;  %4441 = vmatprep.mubr.msk.f32.mxu1 %vm4628_vm1, %v4627_v14 }
 0x19f   :  { %4431 = vmatmul.mubr.msk.f32.vlgmr.msra.gmra.mxu0 %vm23_vm0, %v4791_v48  ;;  %4442 = vmatmul.mubr.msk.f32.vlgmr.msra.gmra.mxu1 %vm23_vm0, %v4791_v48 }
 0x1a0   :  { %4444 = vmatprep.subr.mxu0 %v4627_v14  ;;  %4449 = vmatprep.subr.mxu1 %v4627_v14 }
 0x1a1   :  { %4446 = vmatprep.mubr.msk.f32.mxu0 %vm4628_vm1, %v4627_v14  ;;  %4451 = vmatprep.mubr.msk.f32.mxu1 %vm4628_vm1, %v4627_v14 }
 0x1f2   :  { %v274_v59 = vpop.f32.mrf.mxu0  ;;  %v344_v60 = vpop.f32.mrf.mxu1 }
 0x1f3   :  { %v275_v15 = vadd.f32 %v3940_v10, %v274_v59  ;;  %v345_v16 = vadd.f32 %v3941_v11, %v344_v60 }
 0x1f4   :  { %v4190_v61 = vpop.f32.mrf.mxu0  ;;  %v4201_v62 = vpop.f32.mrf.mxu1 }
 0x1fb   :  { %v414_v63 = vpop.f32.mrf.mxu0  ;;  %v484_v0 = vpop.f32.mrf.mxu1 }
 0x1fc   :  { %v415_v23 = vadd.f32 %v3942_v19, %v414_v63  ;;  %v485_v24 = vadd.f32 %v3943_v20, %v484_v0 }
 0x1fd   :  { %v4212_v1 = vpop.f32.mrf.mxu0  ;;  %v4223_v2 = vpop.f32.mrf.mxu1 }
 0x205   :  { %v557_v3 = vpop.f32.mrf.mxu0  ;;  %v627_v48 = vpop.f32.mrf.mxu1 }
 0x206   :  { %v558_v32 = vadd.f32 %v3944_v27, %v557_v3  ;;  %v628_v33 = vadd.f32 %v3945_v28, %v627_v48 }
 0x207   :  { %v4234_v4 = vpop.f32.mrf.mxu0  ;;  %v4245_v5 = vpop.f32.mrf.mxu1 }
 0x20f   :  { %v697_v6 = vpop.f32.mrf.mxu0  ;;  %v767_v7 = vpop.f32.mrf.mxu1 }
 0x210   :  { %v698_v40 = vadd.f32 %v3946_v36, %v697_v6  ;;  %v768_v41 = vadd.f32 %v3947_v37, %v767_v7 }
 0x211   :  { %v4256_v8 = vpop.f32.mrf.mxu0  ;;  %v4267_v9 = vpop.f32.mrf.mxu1 }
 0x219   :  { %v837_v12 = vpop.f32.mrf.mxu0  ;;  %v907_v13 = vpop.f32.mrf.mxu1 }
 0x21a   :  { %4445 = vmatpush3.xpose.msk.msra.mxu0 %vm1947_vm2, %v837_v12  ;;  %4450 = vmatpush3.xpose.msk.msra.mxu1 %vm1947_vm2, %v907_v13 }
 0x21b   :  { %v4278_v17 = vpop.f32.mrf.mxu0  ;;  %v4289_v18 = vpop.f32.mrf.mxu1  ;;  %4454 = vmatprep.subr.mxu0 %v4627_v14  ;;  %4459 = vmatprep.subr.mxu1 %v4627_v14 }
 0x21d   :  { %4447 = vmatmul.mubr.msk.f32.vlgmr.msra.gmra.mxu0 %vm1947_vm2, %v275_v15  ;;  %4452 = vmatmul.mubr.msk.f32.vlgmr.msra.gmra.mxu1 %vm1947_vm2, %v345_v16 }
 0x21e   :  { %4456 = vmatprep.mubr.msk.f32.mxu0 %vm4628_vm1, %v4627_v14  ;;  %4461 = vmatprep.mubr.msk.f32.mxu1 %vm4628_vm1, %v4627_v14 }
 0x223   :  { %v977_v21 = vpop.f32.mrf.mxu0  ;;  %v1047_v22 = vpop.f32.mrf.mxu1 }
 0x224   :  { %4455 = vmatpush3.xpose.msk.msra.mxu0 %vm1947_vm2, %v977_v21  ;;  %4460 = vmatpush3.xpose.msk.msra.mxu1 %vm1947_vm2, %v1047_v22 }
 0x225   :  { %v4300_v25 = vpop.f32.mrf.mxu0  ;;  %v4311_v26 = vpop.f32.mrf.mxu1  ;;  %4464 = vmatprep.subr.mxu0 %v4627_v14  ;;  %4469 = vmatprep.subr.mxu1 %v4627_v14 }
 0x227   :  { %4457 = vmatmul.mubr.msk.f32.vlgmr.msra.gmra.mxu0 %vm1947_vm2, %v415_v23  ;;  %4462 = vmatmul.mubr.msk.f32.vlgmr.msra.gmra.mxu1 %vm1947_vm2, %v485_v24 }
 0x228   :  { %4466 = vmatprep.mubr.msk.f32.mxu0 %vm4628_vm1, %v4627_v14  ;;  %4471 = vmatprep.mubr.msk.f32.mxu1 %vm4628_vm1, %v4627_v14 }
 0x22d   :  { %v1117_v29 = vpop.f32.mrf.mxu0  ;;  %v1187_v31 = vpop.f32.mrf.mxu1 }
 0x22e   :  { %4465 = vmatpush3.xpose.msk.msra.mxu0 %vm1947_vm2, %v1117_v29  ;;  %4470 = vmatpush3.xpose.msk.msra.mxu1 %vm1947_vm2, %v1187_v31 }
 0x22f   :  { %v4322_v34 = vpop.f32.mrf.mxu0  ;;  %v4333_v35 = vpop.f32.mrf.mxu1  ;;  %4474 = vmatprep.subr.mxu0 %v4627_v14  ;;  %4479 = vmatprep.subr.mxu1 %v4627_v14 }
 0x231   :  { %4467 = vmatmul.mubr.msk.f32.vlgmr.msra.gmra.mxu0 %vm1947_vm2, %v558_v32  ;;  %4472 = vmatmul.mubr.msk.f32.vlgmr.msra.gmra.mxu1 %vm1947_vm2, %v628_v33 }
 0x232   :  { %4476 = vmatprep.mubr.msk.f32.mxu0 %vm4628_vm1, %v4627_v14  ;;  %4481 = vmatprep.mubr.msk.f32.mxu1 %vm4628_vm1, %v4627_v14 }
 0x237   :  { %v1257_v38 = vpop.f32.mrf.mxu0  ;;  %v1327_v39 = vpop.f32.mrf.mxu1 }
 0x238   :  { %4475 = vmatpush3.xpose.msk.msra.mxu0 %vm1947_vm2, %v1257_v38  ;;  %4480 = vmatpush3.xpose.msk.msra.mxu1 %vm1947_vm2, %v1327_v39 }
 0x239   :  { %v4344_v42 = vpop.f32.mrf.mxu0  ;;  %v4355_v43 = vpop.f32.mrf.mxu1  ;;  %4484 = vmatprep.subr.mxu0 %v4627_v14  ;;  %4489 = vmatprep.subr.mxu1 %v4627_v14 }
 0x23b   :  { %4477 = vmatmul.mubr.msk.f32.vlgmr.msra.gmra.mxu0 %vm1947_vm2, %v698_v40  ;;  %4482 = vmatmul.mubr.msk.f32.vlgmr.msra.gmra.mxu1 %vm1947_vm2, %v768_v41 }
 0x23c   :  { %4486 = vmatprep.mubr.msk.f32.mxu0 %vm4628_vm1, %v4627_v14  ;;  %4491 = vmatprep.mubr.msk.f32.mxu1 %vm4628_vm1, %v4627_v14 }
 0x241   :  { %v1453_v46 = vpop.f32.mrf.mxu0  ;;  %v1523_v30 = vpop.f32.mrf.mxu1 }
 0x242   :  { %v1454_v47 = vadd.f32 %v3964_v44, %v1453_v46  ;;  %v1524_v49 = vadd.f32 %v3965_v45, %v1523_v30 }
 0x243   :  { %v4366_v50 = vpop.f32.mrf.mxu0  ;;  %v4377_v51 = vpop.f32.mrf.mxu1 }
 0x244   :  { %4485 = vmatpush3.msra.mxu0 %v1454_v47  ;;  %4490 = vmatpush3.msra.mxu1 %v1524_v49 }
 0x245   :  { %4494 = vmatprep.subr.mxu0 %v4627_v14  ;;  %4499 = vmatprep.subr.mxu1 %v4627_v14 }
 0x24b   :  { %v5239_v52 = vpop.f32.mrf.mxu0  ;;  %v5241_v53 = vpop.f32.mrf.mxu1 }
 0x24d   :  { %v4388_v54 = vpop.f32.mrf.mxu0  ;;  %v4399_v55 = vpop.f32.mrf.mxu1 }
 0x255   :  { %v5243_v56 = vpop.f32.mrf.mxu0  ;;  %v5245_v57 = vpop.f32.mrf.mxu1 }
 0x257   :  { %v4410_v58 = vpop.f32.mrf.mxu0  ;;  %v4421_v59 = vpop.f32.mrf.mxu1 }
 0x25f   :  { %v5247_v60 = vpop.f32.mrf.mxu0  ;;  %v5249_v61 = vpop.f32.mrf.mxu1 }
 0x261   :  { %v4432_v62 = vpop.f32.mrf.mxu0  ;;  %v4443_v63 = vpop.f32.mrf.mxu1 }
 0x2dd   :  { %v2020_v0 = vpop.f32.mrf.mxu0  ;;  %v2096_v1 = vpop.f32.mrf.mxu1 }
 0x2de   :  { %v2559_v2 = vsel %vm1947_vm2, %v2096_v1, -inf  ;;  %v2556_v3 = vsel %vm1947_vm2, %v2020_v0, -inf }
 0x2df   :  { %2560 = vmax.xlane.f32.xlu1 %v2559_v2  ;;  %v4453_v48 = vpop.f32.mrf.mxu1  ;;  %2557 = vmax.xlane.f32.xlu0 %v2556_v3  ;;  %v4448_v4 = vpop.f32.mrf.mxu0 }
 0x2e7   :  { %v2172_v5 = vpop.f32.mrf.mxu0  ;;  %v2248_v6 = vpop.f32.mrf.mxu1 }
 0x2e8   :  { %v2565_v7 = vsel %vm1947_vm2, %v2248_v6, -inf  ;;  %v2562_v8 = vsel %vm1947_vm2, %v2172_v5, -inf }
 0x2e9   :  { %2566 = vmax.xlane.f32.xlu1 %v2565_v7  ;;  %v4463_v9 = vpop.f32.mrf.mxu1  ;;  %2563 = vmax.xlane.f32.xlu0 %v2562_v8  ;;  %v4458_v10 = vpop.f32.mrf.mxu0 }
 0x2f1   :  { %v2324_v11 = vpop.f32.mrf.mxu0  ;;  %v2400_v12 = vpop.f32.mrf.mxu1 }
 0x2f2   :  { %v2571_v13 = vsel %vm1947_vm2, %v2400_v12, -inf  ;;  %v2568_v15 = vsel %vm1947_vm2, %v2324_v11, -inf }
 0x2f3   :  { %2572 = vmax.xlane.f32.xlu1 %v2571_v13  ;;  %v4473_v16 = vpop.f32.mrf.mxu1  ;;  %2569 = vmax.xlane.f32.xlu0 %v2568_v15  ;;  %v4468_v17 = vpop.f32.mrf.mxu0 }
 0x2f4   :  { %v3967_v17 = vld [vmem:[%s5411_s3 + $0x3] ss:$0 sm:$0xff] }
 0x2fb   :  { %v2476_v18 = vpop.f32.mrf.mxu0  ;;  %v2552_v19 = vpop.f32.mrf.mxu1 }
 0x2fc   :  { %v2577_v20 = vsel %vm1947_vm2, %v2552_v19, -inf  ;;  %v2574_v21 = vsel %vm1947_vm2, %v2476_v18, -inf }
 0x2fd   :  { %2578 = vmax.xlane.f32.xlu1 %v2577_v20  ;;  %v4483_v22 = vpop.f32.mrf.mxu1  ;;  %2575 = vmax.xlane.f32.xlu0 %v2574_v21  ;;  %v4478_v23 = vpop.f32.mrf.mxu0 }
 0x368   :  { %v2561_v24 = vpop.xlane.xlu1 %2560  ;;  %v2558_v25 = vpop.xlane.xlu0 %2557 }
 0x369   :  { %v2581_v26 = vsub.f32 %v2096_v1, %v2561_v24  ;;  %v2580_v27 = vsub.f32 %v2020_v0, %v2558_v25  ;;  %v1664_v24 = vadd.f32 %v3967_v17, %v5241_v53 }
 0x36b   :  { %v2590_v28 = vmul.f32 1.442695, %v2581_v26  ;;  %v2588_v29 = vmul.f32 1.442695, %v2580_v27 }
 0x36d   :  { %4573 = vpow2.f32 %v2590_v28 }
 0x36e   :  { %4575 = vpow2.f32 %v2588_v29 }
 0x372   :  { %v2567_v31 = vpop.xlane.xlu1 %2566  ;;  %v2564_v32 = vpop.xlane.xlu0 %2563 }
 0x373   :  { %v2583_v33 = vsub.f32 %v2248_v6, %v2567_v31  ;;  %v2582_v34 = vsub.f32 %v2172_v5, %v2564_v32  ;;  %v3969_v32 = vld [vmem:[%s5411_s3 + $0x5] ss:$0 sm:$0xff] }
 0x375   :  { %v2594_v35 = vmul.f32 1.442695, %v2583_v33  ;;  %v2592_v36 = vmul.f32 1.442695, %v2582_v34  ;;  %v3968_v34 = vld [vmem:[%s5411_s3 + $0x4] ss:$0 sm:$0xff] }
 0x377   :  { %4577 = vpow2.f32 %v2594_v35 }
 0x378   :  { %4579 = vpow2.f32 %v2592_v36 }
 0x37a   :  { %v4574_v37 = vpop.eup %4573 }
 0x37b   :  { %v4576_v38 = vpop.eup %4575  ;;  %v2607_v39 = vsel %vm1947_vm2, %v4574_v37, 0.0 }
 0x37c   :  { %v2573_v40 = vpop.xlane.xlu1 %2572  ;;  %v2570_v41 = vpop.xlane.xlu0 %2569  ;;  %2608 = vadd.xlane.f32.xlu1 %v2607_v39  ;;  %v2604_v42 = vsel %vm1947_vm2, %v4576_v38, 0.0  ;;  %v1804_v39 = vadd.f32 %v3969_v32, %v5245_v57 }
 0x37d   :  { %v2585_v43 = vsub.f32 %v2400_v12, %v2573_v40  ;;  %v2584_v44 = vsub.f32 %v2324_v11, %v2570_v41  ;;  %2605 = vadd.xlane.f32.xlu0 %v2604_v42  ;;  %v1734_v41 = vadd.f32 %v3968_v34, %v5243_v56 }
 0x37f   :  { %v2598_v45 = vmul.f32 1.442695, %v2585_v43  ;;  %v2596_v46 = vmul.f32 1.442695, %v2584_v44 }
 0x381   :  { %4581 = vpow2.f32 %v2598_v45 }
 0x382   :  { %4583 = vpow2.f32 %v2596_v46  ;;  %v3971_v46 = vld [vmem:[%s5411_s3 + $0x7] ss:$0 sm:$0xff] }
 0x384   :  { %v5261_v30 = vpop.eup %4577 }
 0x385   :  { %v5263_v47 = vpop.eup %4579  ;;  %v2613_v49 = vsel %vm1947_vm2, %v5261_v30, 0.0 }
 0x386   :  { %v2579_v50 = vpop.xlane.xlu1 %2578  ;;  %v2576_v51 = vpop.xlane.xlu0 %2575  ;;  %2614 = vadd.xlane.f32.xlu1 %v2613_v49  ;;  %v2610_v54 = vsel %vm1947_vm2, %v5263_v47, 0.0 }
 0x387   :  { %v2587_v55 = vsub.f32 %v2552_v19, %v2579_v50  ;;  %v2586_v58 = vsub.f32 %v2476_v18, %v2576_v51  ;;  %2611 = vadd.xlane.f32.xlu0 %v2610_v54  ;;  %v3966_v19 = vld [vmem:[%s5411_s3 + $0x2] ss:$0 sm:$0xff]  ;;  %v1944_v51 = vadd.f32 %v3971_v46, %v5249_v61 }
 0x388   :  { %v1594_v26 = vadd.f32 %v3966_v19, %v5239_v52 }
 0x389   :  { %v2602_v59 = vmul.f32 1.442695, %v2587_v55  ;;  %v2600_v62 = vmul.f32 1.442695, %v2586_v58 }
 0x38b   :  { %4585 = vpow2.f32 %v2602_v59 }
 0x38c   :  { %4587 = vpow2.f32 %v2600_v62 }
 0x38e   :  { %v5269_v63 = vpop.eup %4581 }
 0x38f   :  { %v5271_v0 = vpop.eup %4583  ;;  %v2619_v1 = vsel %vm1947_vm2, %v5269_v63, 0.0 }
 0x390   :  { %2620 = vadd.xlane.f32.xlu1 %v2619_v1  ;;  %v2616_v2 = vsel %vm1947_vm2, %v5271_v0, 0.0 }
 0x391   :  { %2617 = vadd.xlane.f32.xlu0 %v2616_v2 }
 0x398   :  { %v5277_v3 = vpop.eup %4585 }
 0x399   :  { %v5279_v48 = vpop.eup %4587  ;;  %v2625_v4 = vsel %vm1947_vm2, %v5277_v3, 0.0 }
 0x39a   :  { %2626 = vadd.xlane.f32.xlu1 %v2625_v4  ;;  %v2622_v5 = vsel %vm1947_vm2, %v5279_v48, 0.0 }
 0x39b   :  { %2623 = vadd.xlane.f32.xlu0 %v2622_v5  ;;  %v3252_v5 = vld [vmem:[%s5412_s4] sm:$0xff] }
 0x405   :  { %v2609_v6 = vpop.xlane.xlu1 %2608 }
 0x406   :  { %4589 = vrcp.f32 %v2609_v6  ;;  %v2606_v7 = vpop.xlane.xlu0 %2605 }
 0x407   :  { %4591 = vrcp.f32 %v2606_v7 }
 0x40f   :  { %v2615_v8 = vpop.xlane.xlu1 %2614 }
 0x410   :  { %4593 = vrcp.f32 %v2615_v8  ;;  %v2612_v9 = vpop.xlane.xlu0 %2611 }
 0x411   :  { %4595 = vrcp.f32 %v2612_v9 }
 0x413   :  { %v4590_v10 = vpop.eup %4589 }
 0x414   :  { %v4592_v11 = vpop.eup %4591  ;;  %v2637_v12 = vmul.f32 %v4590_v10, %v2609_v6 }
 0x415   :  { %v2636_v13 = vmul.f32 %v4592_v11, %v2606_v7  ;;  %v3254_v7 = vld [vmem:[%s5412_s4 + $0x10] sm:$0xff] }
 0x416   :  { %v2645_v15 = vsub.f32 2.0, %v2637_v12 }
 0x417   :  { %v2644_v16 = vsub.f32 2.0, %v2636_v13  ;;  %v3256_v13 = vld [vmem:[%s5412_s4 + $0x20] sm:$0xff] }
 0x418   :  { %v2653_v18 = vmul.f32 %v4590_v10, %v2645_v15 }
 0x419   :  { %v2652_v20 = vmul.f32 %v4592_v11, %v2644_v16  ;;  %v2621_v21 = vpop.xlane.xlu1 %2620  ;;  %v3257_v11 = vld [vmem:[%s5412_s4 + $0x28] sm:$0xff] }
 0x41a   :  { %v2661_v22 = vmul.f32 %v4574_v37, %v2653_v18  ;;  %4597 = vrcp.f32 %v2621_v21  ;;  %v2618_v23 = vpop.xlane.xlu0 %2617  ;;  %v3259_v18 = vld [vmem:[%s5412_s4 + $0x38] sm:$0xff] }
 0x41b   :  { %v2660_v25 = vmul.f32 %v4576_v38, %v2652_v20  ;;  %4599 = vrcp.f32 %v2618_v23  ;;  %v3258_v20 = vld [vmem:[%s5412_s4 + $0x30] sm:$0xff] }
 0x41c   :  { %4492 = vmatmul.mubr.msk.f32.vlgmr.msra.gmra.mxu1 %vm1947_vm2, %v2661_v22 }
 0x41d   :  { %v4594_v27 = vpop.eup %4593  ;;  %4487 = vmatmul.mubr.msk.f32.vlgmr.msra.gmra.mxu0 %vm1947_vm2, %v2660_v25  ;;  %4500 = vmatpush3.msra.mxu1 %v1664_v24 }
 0x41e   :  { %v4596_v28 = vpop.eup %4595  ;;  %v2639_v29 = vmul.f32 %v4594_v27, %v2615_v8  ;;  %4495 = vmatpush3.msra.mxu0 %v1594_v26  ;;  %4496 = vmatprep.mubr.msk.f32.mxu0 %vm4628_vm1, %v4627_v14 }
 0x41f   :  { %v2638_v31 = vmul.f32 %v4596_v28, %v2612_v9  ;;  %4501 = vmatprep.mubr.msk.f32.mxu1 %vm4628_vm1, %v4627_v14  ;;  %4504 = vmatprep.subr.mxu0 %v4627_v14 }
 0x420   :  { %v2647_v53 = vsub.f32 2.0, %v2639_v29  ;;  %4509 = vmatprep.subr.mxu1 %v4627_v14 }
 0x421   :  { %v2646_v52 = vsub.f32 2.0, %v2638_v31 }
 0x422   :  { %v2655_v33 = vmul.f32 %v4594_v27, %v2647_v53 }
 0x423   :  { %v2654_v35 = vmul.f32 %v4596_v28, %v2646_v52  ;;  %v2627_v36 = vpop.xlane.xlu1 %2626 }
 0x424   :  { %v2663_v37 = vmul.f32 %v5261_v30, %v2655_v33  ;;  %4601 = vrcp.f32 %v2627_v36  ;;  %v2624_v38 = vpop.xlane.xlu0 %2623 }
 0x425   :  { %v2662_v40 = vmul.f32 %v5263_v47, %v2654_v35  ;;  %4603 = vrcp.f32 %v2624_v38  ;;  %v3970_v47 = vld [vmem:[%s5411_s3 + $0x6] ss:$0 sm:$0xff] }
 0x426   :  { %4502 = vmatmul.mubr.msk.f32.vlgmr.msra.gmra.mxu1 %vm1947_vm2, %v2663_v37  ;;  %v1874_v55 = vadd.f32 %v3970_v47, %v5247_v60 }
 0x427   :  { %v4598_v42 = vpop.eup %4597  ;;  %4497 = vmatmul.mubr.msk.f32.vlgmr.msra.gmra.mxu0 %vm1947_vm2, %v2662_v40  ;;  %4510 = vmatpush3.msra.mxu1 %v1804_v39 }
 0x428   :  { %v4600_v43 = vpop.eup %4599  ;;  %v2641_v44 = vmul.f32 %v4598_v42, %v2621_v21  ;;  %4505 = vmatpush3.msra.mxu0 %v1734_v41  ;;  %4506 = vmatprep.mubr.msk.f32.mxu0 %vm4628_vm1, %v4627_v14 }
 0x429   :  { %v2640_v45 = vmul.f32 %v4600_v43, %v2618_v23  ;;  %4511 = vmatprep.mubr.msk.f32.mxu1 %vm4628_vm1, %v4627_v14  ;;  %4514 = vmatprep.subr.mxu0 %v4627_v14 }
 0x42a   :  { %v2649_v57 = vsub.f32 2.0, %v2641_v44  ;;  %4519 = vmatprep.subr.mxu1 %v4627_v14 }
 0x42b   :  { %v2648_v56 = vsub.f32 2.0, %v2640_v45 }
 0x42c   :  { %v2657_v30 = vmul.f32 %v4598_v42, %v2649_v57 }
 0x42d   :  { %v2656_v49 = vmul.f32 %v4600_v43, %v2648_v56 }
 0x42e   :  { %v2665_v50 = vmul.f32 %v5269_v63, %v2657_v30 }
 0x42f   :  { %v2664_v54 = vmul.f32 %v5271_v0, %v2656_v49 }
 0x430   :  { %4512 = vmatmul.mubr.msk.f32.vlgmr.msra.gmra.mxu1 %vm1947_vm2, %v2665_v50 }
 0x431   :  { %v4602_v58 = vpop.eup %4601  ;;  %4507 = vmatmul.mubr.msk.f32.vlgmr.msra.gmra.mxu0 %vm1947_vm2, %v2664_v54  ;;  %4520 = vmatpush3.msra.mxu1 %v1944_v51 }
 0x432   :  { %v4604_v59 = vpop.eup %4603  ;;  %v2643_v62 = vmul.f32 %v4602_v58, %v2627_v36  ;;  %4515 = vmatpush3.msra.mxu0 %v1874_v55  ;;  %4516 = vmatprep.mubr.msk.f32.mxu0 %vm4628_vm1, %v4627_v14 }
 0x433   :  { %v2642_v1 = vmul.f32 %v4604_v59, %v2624_v38  ;;  %4521 = vmatprep.mubr.msk.f32.mxu1 %vm4628_vm1, %v4627_v14  ;;  %4524 = vmatprep.subr.mxu0 %v4627_v14 }
 0x434   :  { %v2651_v61 = vsub.f32 2.0, %v2643_v62  ;;  %4529 = vmatprep.subr.mxu1 %v4627_v14 }
 0x435   :  { %v2650_v60 = vsub.f32 2.0, %v2642_v1 }
 0x436   :  { %v2659_v63 = vmul.f32 %v4602_v58, %v2651_v61 }
 0x437   :  { %v2658_v0 = vmul.f32 %v4604_v59, %v2650_v60 }
 0x438   :  { %v2667_v2 = vmul.f32 %v5277_v3, %v2659_v63  ;;  %v3253_v3 = vld [vmem:[%s5412_s4 + $0x8] sm:$0xff] }
 0x439   :  { %v2666_v4 = vmul.f32 %v5279_v48, %v2658_v0  ;;  %v3255_v48 = vld [vmem:[%s5412_s4 + $0x18] sm:$0xff]  ;;  %s4629_s4 = smov [#allocation2]  }
 0x43a   :  { %4522 = vmatmul.mubr.msk.f32.vlgmr.msra.gmra.mxu1 %vm1947_vm2, %v2667_v2  ;;  %s3865_s22 = sshll.u32 %s4629_s4, 4  ;;  %s3866_s22 = int_to_ptr.vmem [resolvable:$true] %s3865_s22 }
 0x43b   :  { %4517 = vmatmul.mubr.msk.f32.vlgmr.msra.gmra.mxu0 %vm1947_vm2, %v2666_v4  ;;  %4531 = vmatprep.mubr.msk.f32.mxu1 %vm4628_vm1, %v4627_v14  ;;  %s4605_s23 = scalar_lea.vmem %s3866_s22, 256  ;;  %p4610_p1 = scmp.lt.s32.totalorder %s3866_s22, %s3866_s22 }
 0x43c   :  { %4526 = vmatprep.mubr.msk.f32.mxu0 %vm4628_vm1, %v4627_v14  ;;  %4525 = vmatpush3.msra.mxu0 %v3252_v5  ;;  %p4606_p0 = scmp.ne.s32.totalorder %s3866_s22, %s4605_s23  ;;  %p4611_p2 = scmp.lt.s32.totalorder %s4605_s23, %s4605_s23 }
 0x43d   :  { %4530 = vmatpush3.msra.mxu1 %v3253_v3  ;;  %4534 = vmatprep.subr.mxu0 %v4627_v14 }
 0x43e   :  { %4539 = vmatprep.subr.mxu1 %v4627_v14  ;;  %p4612_p3 = por %p4611_p2, %p4610_p1 }
 0x440   :  { %p4613_p4 = pnand %p4612_p3, %p4606_p0 }
 0x4dc   :  { %v2810_v6 = vpop.f32.mrf.mxu1 }
 0x4dd   :  { %v2737_v8 = vpop.f32.mrf.mxu0  ;;  %4532 = vmatmul.mubr.msk.f32.vlgmr.msra.gmra.mxu1 %vm1947_vm2, %v2810_v6 }
 0x4de   :  { %4527 = vmatmul.mubr.msk.f32.vlgmr.msra.gmra.mxu0 %vm1947_vm2, %v2737_v8  ;;  %v4493_v9 = vpop.f32.mrf.mxu1  ;;  %4540 = vmatpush3.msra.mxu1 %v3255_v48 }
 0x4df   :  { %v4488_v10 = vpop.f32.mrf.mxu0  ;;  %4535 = vmatpush3.msra.mxu0 %v3254_v7  ;;  %4536 = vmatprep.mubr.msk.f32.mxu0 %vm4628_vm1, %v4627_v14 }
 0x4e0   :  { %4541 = vmatprep.mubr.msk.f32.mxu1 %vm4628_vm1, %v4627_v14  ;;  %4544 = vmatprep.subr.mxu0 %v4627_v14 }
 0x4e1   :  { %4549 = vmatprep.subr.mxu1 %v4627_v14 }
 0x4e6   :  { %v2956_v12 = vpop.f32.mrf.mxu1 }
 0x4e7   :  { %v2883_v15 = vpop.f32.mrf.mxu0  ;;  %4542 = vmatmul.mubr.msk.f32.vlgmr.msra.gmra.mxu1 %vm1947_vm2, %v2956_v12 }
 0x4e8   :  { %4537 = vmatmul.mubr.msk.f32.vlgmr.msra.gmra.mxu0 %vm1947_vm2, %v2883_v15  ;;  %v4503_v16 = vpop.f32.mrf.mxu1  ;;  %4550 = vmatpush3.msra.mxu1 %v3257_v11 }
 0x4e9   :  { %v4498_v17 = vpop.f32.mrf.mxu0  ;;  %4545 = vmatpush3.msra.mxu0 %v3256_v13  ;;  %4546 = vmatprep.mubr.msk.f32.mxu0 %vm4628_vm1, %v4627_v14 }
 0x4ea   :  { %4551 = vmatprep.mubr.msk.f32.mxu1 %vm4628_vm1, %v4627_v14  ;;  %4554 = vmatprep.subr.mxu0 %v4627_v14 }
 0x4eb   :  { %4559 = vmatprep.subr.mxu1 %v4627_v14 }
 0x4f0   :  { %v3102_v19 = vpop.f32.mrf.mxu1 }
 0x4f1   :  { %v3029_v21 = vpop.f32.mrf.mxu0  ;;  %4552 = vmatmul.mubr.msk.f32.vlgmr.msra.gmra.mxu1 %vm1947_vm2, %v3102_v19 }
 0x4f2   :  { %4547 = vmatmul.mubr.msk.f32.vlgmr.msra.gmra.mxu0 %vm1947_vm2, %v3029_v21  ;;  %v4513_v22 = vpop.f32.mrf.mxu1  ;;  %4560 = vmatpush3.msra.mxu1 %v3259_v18 }
 0x4f3   :  { %v4508_v23 = vpop.f32.mrf.mxu0  ;;  %4555 = vmatpush3.msra.mxu0 %v3258_v20  ;;  %4556 = vmatprep.mubr.msk.f32.mxu0 %vm4628_vm1, %v4627_v14 }
 0x4f4   :  { %4561 = vmatprep.mubr.msk.f32.mxu1 %vm4628_vm1, %v4627_v14 }
 0x4fa   :  { %v3248_v24 = vpop.f32.mrf.mxu1 }
 0x4fb   :  { %v3175_v25 = vpop.f32.mrf.mxu0  ;;  %4562 = vmatmul.mubr.msk.f32.vlgmr.msra.gmra.mxu1 %vm1947_vm2, %v3248_v24 }
 0x4fc   :  { %4557 = vmatmul.mubr.msk.f32.vlgmr.msra.gmra.mxu0 %vm1947_vm2, %v3175_v25  ;;  %v4523_v26 = vpop.f32.mrf.mxu1 }
 0x4fd   :  { %v4518_v27 = vpop.f32.mrf.mxu0 }
 0x59d   :  { %v3402_v28 = vpop.f32.mrf.mxu1 }
 0x59e   :  { %v3329_v29 = vpop.f32.mrf.mxu0  ;;  %v3845_v32 = vsel %vm23_vm0, %v3402_v28, 0.0 }
 0x59f   :  { %v4533_v31 = vpop.f32.mrf.mxu1  ;;  %v3844_v52 = vsel %vm23_vm0, %v3329_v29, 0.0 }
 0x5a0   :  { %v4528_v53 = vpop.f32.mrf.mxu0  ;;  %v3846_v34 = vadd.f32 %v3845_v32, %v3844_v52 }
 0x5a7   :  { %v3548_v33 = vpop.f32.mrf.mxu1 }
 0x5a8   :  { %v3475_v35 = vpop.f32.mrf.mxu0  ;;  %v3849_v39 = vsel %vm23_vm0, %v3548_v33, 0.0 }
 0x5a9   :  { %v3847_v14 = vsel %vm23_vm0, %v3475_v35, 0.0  ;;  %v4543_v36 = vpop.f32.mrf.mxu1 }
 0x5aa   :  { %v3848_v37 = vadd.f32 %v3847_v14, %v3846_v34  ;;  %v4538_v38 = vpop.f32.mrf.mxu0 }
 0x5ac   :  { %v3850_v40 = vadd.f32 %v3849_v39, %v3848_v37 }
 0x5ae   :  { %3858 = vst.msk [vmem:[#allocation2] sm:$0xff] %vm23_vm0, %v3850_v40 }
 0x5b1   :  { %v3694_v41 = vpop.f32.mrf.mxu1 }
 0x5b2   :  { %v3621_v42 = vpop.f32.mrf.mxu0  ;;  %v3852_v57 = vsel %vm23_vm0, %v3694_v41, 0.0 }
 0x5b3   :  { %v4553_v43 = vpop.f32.mrf.mxu1  ;;  %v3851_v45 = vsel %vm23_vm0, %v3621_v42, 0.0 }
 0x5b4   :  { %v4548_v44 = vpop.f32.mrf.mxu0  ;;  %v3853_v46 = vadd.f32 %v3852_v57, %v3851_v45 }
 0x5bb   :  { %v3840_v56 = vpop.f32.mrf.mxu1 }
 0x5bc   :  { %v3767_v30 = vpop.f32.mrf.mxu0  ;;  %v3856_v54 = vsel %vm23_vm0, %v3840_v56, 0.0 }
 0x5bd   :  { %v3854_v47 = vsel %vm23_vm0, %v3767_v30, 0.0  ;;  %v4563_v49 = vpop.f32.mrf.mxu1 }
 0x5be   :  { %v3855_v50 = vadd.f32 %v3854_v47, %v3853_v46  ;;  %v4558_v51 = vpop.f32.mrf.mxu0 }
 0x5c0   :  { %v3857_v55 = vadd.f32 %v3856_v54, %v3855_v50 }
 0x5c2   :  { %3859 = vst.msk [vmem:[#allocation2 + $0x8] sm:$0xff] %vm23_vm0, %v3857_v55 }
 0x5c3   :  { %4616 = shalt.err (!%p4613_p4)
}
 0x5c4   :  { %s4630_s24 = smov 128   ;;  %s4631_s25 = smov 8  }
 0x5c5   :  { %3871 = dma.vmem_to_hbm [thread:$0]  %s3866_s22, 256, %s5413_s5, [#allocation3], %s4630_s24, %s4630_s24, %s4631_s25  }
 0x5c6   :  { %4625 = dma.done.wait [#allocation3], 256  }
 0x5c7   :  { %4626 = vsyncadd [#allocation3], 4294967040 }
 0x5c8   :  { %3875 = vsyncpa [#allocation3], 1 }

</bundles_post_ra>
